<compile_context>
chip_gen: v6e
topology: v6e:2x2x1
jax: 0.10.0
libtpu: 0.0.40
codegen_flags: <defaults>
</compile_context>

<pallas_src>
import functools

import jax
import jax.numpy as jnp
from jax.experimental import pallas as pl
from jax.experimental.pallas import tpu as pltpu


def _afm_kernel(pairs, num_fields, embed_dim, apply_sigmoid,
                embed_ref, lin_ref, w1t_ref, b1_ref, w2_ref, p_ref, out_ref):
    """embed_ref: [F*D, TB] bf16; lin_ref: [1, TB] f32; w1t_ref: [A, D] bf16;
    b1_ref/w2_ref: [A, 1] f32; p_ref: [D, 1] f32; out_ref: [1, TB] f32."""
    del num_fields
    D = embed_dim
    P = len(pairs)

    w1t = w1t_ref[...]            # (A, D) bf16 — MXU LHS, tiny, loaded once
    b1 = b1_ref[...]              # (A, 1) f32
    w2 = w2_ref[...]              # (A, 1) f32
    p_col = p_ref[...]            # (D, 1) f32

    logit_rows = []               # P x (1, TB) f32
    s_rows = []                   # P x (1, TB) f32

    # --- stream per pair: interaction slab never survives past its reductions ---
    for (i, j) in pairs:
        xi = embed_ref[pl.ds(i * D, D), :].astype(jnp.float32)   # (D, TB)
        xj = embed_ref[pl.ds(j * D, D), :].astype(jnp.float32)
        att_f = xi * xj                                          # (D, TB) f32

        # attention hidden layer: small bf16 MXU matmul (A,D)@(D,TB)
        h = jnp.dot(w1t, att_f.astype(jnp.bfloat16),
                    preferred_element_type=jnp.float32)          # (A, TB)
        h = jnp.maximum(h + b1, 0.0)
        # second layer (A -> 1): VPU multiply + sublane reduce (no N=1 matmul)
        logit_rows.append(jnp.sum(h * w2, axis=0, keepdims=True))   # (1, TB)
        # fold the p-projection in now so att_f can die
        s_rows.append(jnp.sum(att_f * p_col, axis=0, keepdims=True))  # (1, TB)

    # --- softmax over the pair axis (statically unrolled, (1, TB) rows) ---
    m = logit_rows[0]
    for q in range(1, P):
        m = jnp.maximum(m, logit_rows[q])
    es = [jnp.exp(l - m) for l in logit_rows]
    denom = es[0]
    for q in range(1, P):
        denom = denom + es[q]

    # --- attention-weighted sum of per-pair projections ---
    weighted = es[0] * s_rows[0]
    for q in range(1, P):
        weighted = weighted + es[q] * s_rows[q]                  # (1, TB)
    fm = weighted * pl.reciprocal(denom, approx=True)            # (1, TB)

    # --- add precomputed first-order part, optional sigmoid, lane-dense store ---
    out = lin_ref[...] + fm
    if apply_sigmoid:
        out = jax.nn.sigmoid(out)
    out_ref[...] = out.astype(out_ref.dtype)


def afm_forward(sparse_idx, dense, params, *, tile_b=512, sigmoid_out=False,
                embed_dtype=jnp.bfloat16, vmem_limit_bytes=None):
    """sparse_idx: [B, F] int32 field indices; dense: [B, Dd] float32. Returns [B]."""
    emb_tables = params["embed_tables"]   # list of [vocab_f, D]
    lin_tables = params["lin_tables"]     # list of [vocab_f]
    w1, b1, w2, p_w = params["w1"], params["b1"], params["w2"], params["p"]
    wd, bias = params["wd"], params["bias"]

    B, F = sparse_idx.shape
    D, A = w1.shape

    assert tile_b % 128 == 0, "tile_b must be a multiple of 128 (lane-dense blocks)"

    # ---- glue (gathers + first-order linear part) in plain JAX ----
    # natural row gathers -> [F, B, D], one fused transpose+reshape -> [F*D, B]
    emb = jnp.stack([emb_tables[f][sparse_idx[:, f]] for f in range(F)], axis=0)
    embed_x = jnp.transpose(emb.astype(embed_dtype), (0, 2, 1)).reshape(F * D, B)

    sp_lin = sum(lin_tables[f][sparse_idx[:, f]] for f in range(F))   # [B]
    lin = sp_lin + (dense @ wd)[:, 0] + bias[0, 0]                    # [B]

    # pad batch to a multiple of tile_b
    n_tiles = -(-B // tile_b)
    B_pad = n_tiles * tile_b
    if B_pad != B:
        embed_x = jnp.pad(embed_x, ((0, 0), (0, B_pad - B)))
        lin = jnp.pad(lin, (0, B_pad - B))
    lin_row = lin.reshape(1, B_pad).astype(jnp.float32)               # [1, B_pad]

    pairs = tuple((i, j) for i in range(F) for j in range(i + 1, F))
    kernel = functools.partial(_afm_kernel, pairs, F, D, sigmoid_out)

    out = pl.pallas_call(
        kernel,
        out_shape=jax.ShapeDtypeStruct((1, B_pad), jnp.float32),
        grid=(n_tiles,),
        in_specs=[
            pl.BlockSpec((F * D, tile_b), lambda b: (0, b)),     # embeddings [F*D,B]
            pl.BlockSpec((1, tile_b), lambda b: (0, b)),         # first-order lin
            pl.BlockSpec((A, D), lambda b: (0, 0)),              # w1^T (bf16)
            pl.BlockSpec((A, 1), lambda b: (0, 0)),              # b1 (column)
            pl.BlockSpec((A, 1), lambda b: (0, 0)),              # w2 (column)
            pl.BlockSpec((D, 1), lambda b: (0, 0)),              # p  (column)
        ],
        out_specs=pl.BlockSpec((1, tile_b), lambda b: (0, b)),
        compiler_params=pltpu.CompilerParams(
            dimension_semantics=("parallel",),
            vmem_limit_bytes=vmem_limit_bytes),
    )(embed_x, lin_row,
      w1.T.astype(jnp.bfloat16),                   # bf16 MXU LHS
      b1.reshape(A, 1).astype(jnp.float32),
      w2.reshape(A, 1).astype(jnp.float32),
      p_w.astype(jnp.float32))
    return out[0, :B]                                                  # [B]


def afm_reference(sparse_idx, dense, params, *, sigmoid_out=False,
                  embed_dtype=jnp.float32):
    """Pure-JAX reference matching the PyTorch forward semantics."""
    emb_tables = params["embed_tables"]
    lin_tables = params["lin_tables"]
    w1, b1, w2, p_w = params["w1"], params["b1"], params["w2"], params["p"]
    wd, bias = params["wd"], params["bias"]
    hi = jax.lax.Precision.HIGHEST

    B, F = sparse_idx.shape
    x = jnp.stack([emb_tables[f][sparse_idx[:, f]] for f in range(F)], axis=1)
    x = x.astype(embed_dtype).astype(jnp.float32)
    pairs = [(i, j) for i in range(F) for j in range(i + 1, F)]
    x1 = jnp.stack([x[:, i, :] for (i, _) in pairs], axis=1)
    x2 = jnp.stack([x[:, j, :] for (_, j) in pairs], axis=1)
    att_x = x1 * x2
    h = jnp.maximum(jnp.dot(att_x, w1, precision=hi) + b1[0], 0.0)
    logits = jnp.dot(h, w2, precision=hi)               # [B, P, 1]
    att = jax.nn.softmax(logits, axis=1)
    att_out = jnp.sum(att_x * att, axis=1)               # [B, D]
    fm_out = jnp.dot(att_out, p_w, precision=hi)[:, 0]   # [B]
    sp_lin = sum(lin_tables[f][sparse_idx[:, f]] for f in range(F))
    lin = sp_lin + (dense @ wd)[:, 0] + bias[0, 0]
    out = lin + fm_out
    if sigmoid_out:
        out = jax.nn.sigmoid(out)
    return out


def make_params(key, vocab_sizes, embed_dim, attention_factor, num_dense):
    keys = jax.random.split(key, 2 * len(vocab_sizes) + 6)
    embed_tables = [0.1 * jax.random.normal(keys[i], (v, embed_dim), jnp.float32)
                    for i, v in enumerate(vocab_sizes)]
    lin_tables = [0.1 * jax.random.normal(keys[len(vocab_sizes) + i], (v,), jnp.float32)
                  for i, v in enumerate(vocab_sizes)]
    k = 2 * len(vocab_sizes)
    return {
        "embed_tables": embed_tables,
        "lin_tables": lin_tables,
        "w1": 0.1 * jax.random.normal(keys[k + 0], (embed_dim, attention_factor), jnp.float32),
        "b1": 0.1 * jax.random.normal(keys[k + 1], (1, attention_factor), jnp.float32),
        "w2": 0.1 * jax.random.normal(keys[k + 2], (attention_factor, 1), jnp.float32),
        "p": 0.1 * jax.random.normal(keys[k + 3], (embed_dim, 1), jnp.float32),
        "wd": 0.1 * jax.random.normal(keys[k + 4], (num_dense, 1), jnp.float32),
        "bias": 0.1 * jax.random.normal(keys[k + 5], (1, 1), jnp.float32),
    }


if __name__ == "__main__":
    B = 256          # batch (small test size)
    F = 4            # number of sparse fields
    D = 32           # embed_dim
    A = 16           # attention_factor
    Dd = 3           # number of dense features
    vocab_sizes = [100, 50, 30, 20]
    TILE_B = 128     # lane-dense batch tile; n_tiles=2 keeps both v7x TCs busy

    key = jax.random.PRNGKey(0)
    k_param, k_sparse, k_dense = jax.random.split(key, 3)

    params = make_params(k_param, vocab_sizes, D, A, Dd)
    sparse_idx = jnp.stack(
        [jax.random.randint(jax.random.fold_in(k_sparse, f), (B,), 0, vocab_sizes[f])
         for f in range(F)], axis=1).astype(jnp.int32)                  # [B, F]
    dense = jax.random.normal(k_dense, (B, Dd), jnp.float32)            # [B, Dd]

    out = afm_forward(sparse_idx, dense, params, tile_b=TILE_B,
                      sigmoid_out=False, embed_dtype=jnp.bfloat16)
    out = jax.block_until_ready(out)

    # reference uses identically bf16-rounded embeddings, f32 math
    ref = afm_reference(sparse_idx, dense, params, sigmoid_out=False,
                        embed_dtype=jnp.bfloat16)
    assert out.shape == (B,)
    assert jnp.allclose(out, ref, rtol=1e-3, atol=1e-4), (
        float(jnp.max(jnp.abs(out - ref))),)

    print("KERNEL_OK")
</pallas_src>

<mosaic_0001>
module attributes {stable_mosaic.version = 11 : i64} {
  func.func @_afm_kernel(%arg0: i32, %arg1: memref<128x128xbf16, #tpu.memory_space<vmem>>, %arg2: memref<1x128xf32, #tpu.memory_space<vmem>>, %arg3: memref<16x32xbf16, #tpu.memory_space<vmem>>, %arg4: memref<16x1xf32, #tpu.memory_space<vmem>>, %arg5: memref<16x1xf32, #tpu.memory_space<vmem>>, %arg6: memref<32x1xf32, #tpu.memory_space<vmem>>, %arg7: memref<1x128xf32, #tpu.memory_space<vmem>>) attributes {dimension_semantics = [#tpu.dimension_semantics<parallel>], iteration_bounds = array<i64: 2>, scalar_prefetch = 0 : i64, scratch_operands = 0 : i64, tpu.core_type = #tpu.core_type<tc>, window_params = [{transform_indices = @transform_0, window_bounds = array<i64: 128, 128>}, {transform_indices = @transform_1, window_bounds = array<i64: 1, 128>}, {pipeline_mode = #tpu.pipeline_mode<synchronous>, transform_indices = @transform_2, window_bounds = array<i64: 16, 32>}, {pipeline_mode = #tpu.pipeline_mode<synchronous>, transform_indices = @transform_3, window_bounds = array<i64: 16, 1>}, {pipeline_mode = #tpu.pipeline_mode<synchronous>, transform_indices = @transform_4, window_bounds = array<i64: 16, 1>}, {pipeline_mode = #tpu.pipeline_mode<synchronous>, transform_indices = @transform_5, window_bounds = array<i64: 32, 1>}, {transform_indices = @transform_6, window_bounds = array<i64: 1, 128>}]} {
    %c0 = arith.constant 0 : index
    %c0_0 = arith.constant 0 : index
    %0 = vector.load %arg3[%c0, %c0_0] : memref<16x32xbf16, #tpu.memory_space<vmem>>, vector<16x32xbf16>
    %c0_1 = arith.constant 0 : index
    %c0_2 = arith.constant 0 : index
    %1 = vector.load %arg4[%c0_1, %c0_2] : memref<16x1xf32, #tpu.memory_space<vmem>>, vector<16x1xf32>
    %c0_3 = arith.constant 0 : index
    %c0_4 = arith.constant 0 : index
    %2 = vector.load %arg5[%c0_3, %c0_4] : memref<16x1xf32, #tpu.memory_space<vmem>>, vector<16x1xf32>
    %c0_5 = arith.constant 0 : index
    %c0_6 = arith.constant 0 : index
    %3 = vector.load %arg6[%c0_5, %c0_6] : memref<32x1xf32, #tpu.memory_space<vmem>>, vector<32x1xf32>
    %c0_7 = arith.constant 0 : index
    %c0_8 = arith.constant 0 : index
    %4 = vector.load %arg1[%c0_7, %c0_8] : memref<128x128xbf16, #tpu.memory_space<vmem>>, vector<32x128xbf16>
    %5 = arith.extf %4 : vector<32x128xbf16> to vector<32x128xf32>
    %c32 = arith.constant 32 : index
    %c0_9 = arith.constant 0 : index
    %6 = vector.load %arg1[%c32, %c0_9] : memref<128x128xbf16, #tpu.memory_space<vmem>>, vector<32x128xbf16>
    %7 = arith.extf %6 : vector<32x128xbf16> to vector<32x128xf32>
    %8 = arith.mulf %5, %7 : vector<32x128xf32>
    %9 = arith.truncf %8 : vector<32x128xf32> to vector<32x128xbf16>
    %cst = arith.constant dense<0.000000e+00> : vector<16x128xf32>
    %10 = tpu.matmul %0, %9, %cst {dimension_numbers = #tpu.dot_dimension_numbers<[1], [0], [0], [1], [0, 0, 1, 1], [], []>} : vector<16x32xbf16>, vector<32x128xbf16>, vector<16x128xf32> -> vector<16x128xf32>
    %11 = vector.broadcast %1 : vector<16x1xf32> to vector<16x128xf32>
    %12 = arith.addf %10, %11 : vector<16x128xf32>
    %cst_10 = arith.constant 0.000000e+00 : f32
    %13 = vector.broadcast %cst_10 : f32 to vector<16x128xf32>
    %14 = arith.maximumf %12, %13 : vector<16x128xf32>
    %15 = vector.broadcast %2 : vector<16x1xf32> to vector<16x128xf32>
    %16 = arith.mulf %14, %15 : vector<16x128xf32>
    %cst_11 = arith.constant dense<0.000000e+00> : vector<128xf32>
    %17 = vector.multi_reduction <add>, %16, %cst_11 [0] : vector<16x128xf32> to vector<128xf32>
    %18 = vector.shape_cast %17 : vector<128xf32> to vector<1x128xf32>
    %19 = vector.broadcast %3 : vector<32x1xf32> to vector<32x128xf32>
    %20 = arith.mulf %8, %19 : vector<32x128xf32>
    %cst_12 = arith.constant dense<0.000000e+00> : vector<128xf32>
    %21 = vector.multi_reduction <add>, %20, %cst_12 [0] : vector<32x128xf32> to vector<128xf32>
    %22 = vector.shape_cast %21 : vector<128xf32> to vector<1x128xf32>
    %c0_13 = arith.constant 0 : index
    %c0_14 = arith.constant 0 : index
    %23 = vector.load %arg1[%c0_13, %c0_14] : memref<128x128xbf16, #tpu.memory_space<vmem>>, vector<32x128xbf16>
    %24 = arith.extf %23 : vector<32x128xbf16> to vector<32x128xf32>
    %c64 = arith.constant 64 : index
    %c0_15 = arith.constant 0 : index
    %25 = vector.load %arg1[%c64, %c0_15] : memref<128x128xbf16, #tpu.memory_space<vmem>>, vector<32x128xbf16>
    %26 = arith.extf %25 : vector<32x128xbf16> to vector<32x128xf32>
    %27 = arith.mulf %24, %26 : vector<32x128xf32>
    %28 = arith.truncf %27 : vector<32x128xf32> to vector<32x128xbf16>
    %cst_16 = arith.constant dense<0.000000e+00> : vector<16x128xf32>
    %29 = tpu.matmul %0, %28, %cst_16 {dimension_numbers = #tpu.dot_dimension_numbers<[1], [0], [0], [1], [0, 0, 1, 1], [], []>} : vector<16x32xbf16>, vector<32x128xbf16>, vector<16x128xf32> -> vector<16x128xf32>
    %30 = vector.broadcast %1 : vector<16x1xf32> to vector<16x128xf32>
    %31 = arith.addf %29, %30 : vector<16x128xf32>
    %cst_17 = arith.constant 0.000000e+00 : f32
    %32 = vector.broadcast %cst_17 : f32 to vector<16x128xf32>
    %33 = arith.maximumf %31, %32 : vector<16x128xf32>
    %34 = vector.broadcast %2 : vector<16x1xf32> to vector<16x128xf32>
    %35 = arith.mulf %33, %34 : vector<16x128xf32>
    %cst_18 = arith.constant dense<0.000000e+00> : vector<128xf32>
    %36 = vector.multi_reduction <add>, %35, %cst_18 [0] : vector<16x128xf32> to vector<128xf32>
    %37 = vector.shape_cast %36 : vector<128xf32> to vector<1x128xf32>
    %38 = vector.broadcast %3 : vector<32x1xf32> to vector<32x128xf32>
    %39 = arith.mulf %27, %38 : vector<32x128xf32>
    %cst_19 = arith.constant dense<0.000000e+00> : vector<128xf32>
    %40 = vector.multi_reduction <add>, %39, %cst_19 [0] : vector<32x128xf32> to vector<128xf32>
    %41 = vector.shape_cast %40 : vector<128xf32> to vector<1x128xf32>
    %c0_20 = arith.constant 0 : index
    %c0_21 = arith.constant 0 : index
    %42 = vector.load %arg1[%c0_20, %c0_21] : memref<128x128xbf16, #tpu.memory_space<vmem>>, vector<32x128xbf16>
    %43 = arith.extf %42 : vector<32x128xbf16> to vector<32x128xf32>
    %c96 = arith.constant 96 : index
    %c0_22 = arith.constant 0 : index
    %44 = vector.load %arg1[%c96, %c0_22] : memref<128x128xbf16, #tpu.memory_space<vmem>>, vector<32x128xbf16>
    %45 = arith.extf %44 : vector<32x128xbf16> to vector<32x128xf32>
    %46 = arith.mulf %43, %45 : vector<32x128xf32>
    %47 = arith.truncf %46 : vector<32x128xf32> to vector<32x128xbf16>
    %cst_23 = arith.constant dense<0.000000e+00> : vector<16x128xf32>
    %48 = tpu.matmul %0, %47, %cst_23 {dimension_numbers = #tpu.dot_dimension_numbers<[1], [0], [0], [1], [0, 0, 1, 1], [], []>} : vector<16x32xbf16>, vector<32x128xbf16>, vector<16x128xf32> -> vector<16x128xf32>
    %49 = vector.broadcast %1 : vector<16x1xf32> to vector<16x128xf32>
    %50 = arith.addf %48, %49 : vector<16x128xf32>
    %cst_24 = arith.constant 0.000000e+00 : f32
    %51 = vector.broadcast %cst_24 : f32 to vector<16x128xf32>
    %52 = arith.maximumf %50, %51 : vector<16x128xf32>
    %53 = vector.broadcast %2 : vector<16x1xf32> to vector<16x128xf32>
    %54 = arith.mulf %52, %53 : vector<16x128xf32>
    %cst_25 = arith.constant dense<0.000000e+00> : vector<128xf32>
    %55 = vector.multi_reduction <add>, %54, %cst_25 [0] : vector<16x128xf32> to vector<128xf32>
    %56 = vector.shape_cast %55 : vector<128xf32> to vector<1x128xf32>
    %57 = vector.broadcast %3 : vector<32x1xf32> to vector<32x128xf32>
    %58 = arith.mulf %46, %57 : vector<32x128xf32>
    %cst_26 = arith.constant dense<0.000000e+00> : vector<128xf32>
    %59 = vector.multi_reduction <add>, %58, %cst_26 [0] : vector<32x128xf32> to vector<128xf32>
    %60 = vector.shape_cast %59 : vector<128xf32> to vector<1x128xf32>
    %c32_27 = arith.constant 32 : index
    %c0_28 = arith.constant 0 : index
    %61 = vector.load %arg1[%c32_27, %c0_28] : memref<128x128xbf16, #tpu.memory_space<vmem>>, vector<32x128xbf16>
    %62 = arith.extf %61 : vector<32x128xbf16> to vector<32x128xf32>
    %c64_29 = arith.constant 64 : index
    %c0_30 = arith.constant 0 : index
    %63 = vector.load %arg1[%c64_29, %c0_30] : memref<128x128xbf16, #tpu.memory_space<vmem>>, vector<32x128xbf16>
    %64 = arith.extf %63 : vector<32x128xbf16> to vector<32x128xf32>
    %65 = arith.mulf %62, %64 : vector<32x128xf32>
    %66 = arith.truncf %65 : vector<32x128xf32> to vector<32x128xbf16>
    %cst_31 = arith.constant dense<0.000000e+00> : vector<16x128xf32>
    %67 = tpu.matmul %0, %66, %cst_31 {dimension_numbers = #tpu.dot_dimension_numbers<[1], [0], [0], [1], [0, 0, 1, 1], [], []>} : vector<16x32xbf16>, vector<32x128xbf16>, vector<16x128xf32> -> vector<16x128xf32>
    %68 = vector.broadcast %1 : vector<16x1xf32> to vector<16x128xf32>
    %69 = arith.addf %67, %68 : vector<16x128xf32>
    %cst_32 = arith.constant 0.000000e+00 : f32
    %70 = vector.broadcast %cst_32 : f32 to vector<16x128xf32>
    %71 = arith.maximumf %69, %70 : vector<16x128xf32>
    %72 = vector.broadcast %2 : vector<16x1xf32> to vector<16x128xf32>
    %73 = arith.mulf %71, %72 : vector<16x128xf32>
    %cst_33 = arith.constant dense<0.000000e+00> : vector<128xf32>
    %74 = vector.multi_reduction <add>, %73, %cst_33 [0] : vector<16x128xf32> to vector<128xf32>
    %75 = vector.shape_cast %74 : vector<128xf32> to vector<1x128xf32>
    %76 = vector.broadcast %3 : vector<32x1xf32> to vector<32x128xf32>
    %77 = arith.mulf %65, %76 : vector<32x128xf32>
    %cst_34 = arith.constant dense<0.000000e+00> : vector<128xf32>
    %78 = vector.multi_reduction <add>, %77, %cst_34 [0] : vector<32x128xf32> to vector<128xf32>
    %79 = vector.shape_cast %78 : vector<128xf32> to vector<1x128xf32>
    %c32_35 = arith.constant 32 : index
    %c0_36 = arith.constant 0 : index
    %80 = vector.load %arg1[%c32_35, %c0_36] : memref<128x128xbf16, #tpu.memory_space<vmem>>, vector<32x128xbf16>
    %81 = arith.extf %80 : vector<32x128xbf16> to vector<32x128xf32>
    %c96_37 = arith.constant 96 : index
    %c0_38 = arith.constant 0 : index
    %82 = vector.load %arg1[%c96_37, %c0_38] : memref<128x128xbf16, #tpu.memory_space<vmem>>, vector<32x128xbf16>
    %83 = arith.extf %82 : vector<32x128xbf16> to vector<32x128xf32>
    %84 = arith.mulf %81, %83 : vector<32x128xf32>
    %85 = arith.truncf %84 : vector<32x128xf32> to vector<32x128xbf16>
    %cst_39 = arith.constant dense<0.000000e+00> : vector<16x128xf32>
    %86 = tpu.matmul %0, %85, %cst_39 {dimension_numbers = #tpu.dot_dimension_numbers<[1], [0], [0], [1], [0, 0, 1, 1], [], []>} : vector<16x32xbf16>, vector<32x128xbf16>, vector<16x128xf32> -> vector<16x128xf32>
    %87 = vector.broadcast %1 : vector<16x1xf32> to vector<16x128xf32>
    %88 = arith.addf %86, %87 : vector<16x128xf32>
    %cst_40 = arith.constant 0.000000e+00 : f32
    %89 = vector.broadcast %cst_40 : f32 to vector<16x128xf32>
    %90 = arith.maximumf %88, %89 : vector<16x128xf32>
    %91 = vector.broadcast %2 : vector<16x1xf32> to vector<16x128xf32>
    %92 = arith.mulf %90, %91 : vector<16x128xf32>
    %cst_41 = arith.constant dense<0.000000e+00> : vector<128xf32>
    %93 = vector.multi_reduction <add>, %92, %cst_41 [0] : vector<16x128xf32> to vector<128xf32>
    %94 = vector.shape_cast %93 : vector<128xf32> to vector<1x128xf32>
    %95 = vector.broadcast %3 : vector<32x1xf32> to vector<32x128xf32>
    %96 = arith.mulf %84, %95 : vector<32x128xf32>
    %cst_42 = arith.constant dense<0.000000e+00> : vector<128xf32>
    %97 = vector.multi_reduction <add>, %96, %cst_42 [0] : vector<32x128xf32> to vector<128xf32>
    %98 = vector.shape_cast %97 : vector<128xf32> to vector<1x128xf32>
    %c64_43 = arith.constant 64 : index
    %c0_44 = arith.constant 0 : index
    %99 = vector.load %arg1[%c64_43, %c0_44] : memref<128x128xbf16, #tpu.memory_space<vmem>>, vector<32x128xbf16>
    %100 = arith.extf %99 : vector<32x128xbf16> to vector<32x128xf32>
    %c96_45 = arith.constant 96 : index
    %c0_46 = arith.constant 0 : index
    %101 = vector.load %arg1[%c96_45, %c0_46] : memref<128x128xbf16, #tpu.memory_space<vmem>>, vector<32x128xbf16>
    %102 = arith.extf %101 : vector<32x128xbf16> to vector<32x128xf32>
    %103 = arith.mulf %100, %102 : vector<32x128xf32>
    %104 = arith.truncf %103 : vector<32x128xf32> to vector<32x128xbf16>
    %cst_47 = arith.constant dense<0.000000e+00> : vector<16x128xf32>
    %105 = tpu.matmul %0, %104, %cst_47 {dimension_numbers = #tpu.dot_dimension_numbers<[1], [0], [0], [1], [0, 0, 1, 1], [], []>} : vector<16x32xbf16>, vector<32x128xbf16>, vector<16x128xf32> -> vector<16x128xf32>
    %106 = vector.broadcast %1 : vector<16x1xf32> to vector<16x128xf32>
    %107 = arith.addf %105, %106 : vector<16x128xf32>
    %cst_48 = arith.constant 0.000000e+00 : f32
    %108 = vector.broadcast %cst_48 : f32 to vector<16x128xf32>
    %109 = arith.maximumf %107, %108 : vector<16x128xf32>
    %110 = vector.broadcast %2 : vector<16x1xf32> to vector<16x128xf32>
    %111 = arith.mulf %109, %110 : vector<16x128xf32>
    %cst_49 = arith.constant dense<0.000000e+00> : vector<128xf32>
    %112 = vector.multi_reduction <add>, %111, %cst_49 [0] : vector<16x128xf32> to vector<128xf32>
    %113 = vector.shape_cast %112 : vector<128xf32> to vector<1x128xf32>
    %114 = vector.broadcast %3 : vector<32x1xf32> to vector<32x128xf32>
    %115 = arith.mulf %103, %114 : vector<32x128xf32>
    %cst_50 = arith.constant dense<0.000000e+00> : vector<128xf32>
    %116 = vector.multi_reduction <add>, %115, %cst_50 [0] : vector<32x128xf32> to vector<128xf32>
    %117 = vector.shape_cast %116 : vector<128xf32> to vector<1x128xf32>
    %118 = arith.maximumf %18, %37 : vector<1x128xf32>
    %119 = arith.maximumf %118, %56 : vector<1x128xf32>
    %120 = arith.maximumf %119, %75 : vector<1x128xf32>
    %121 = arith.maximumf %120, %94 : vector<1x128xf32>
    %122 = arith.maximumf %121, %113 : vector<1x128xf32>
    %123 = arith.subf %18, %122 : vector<1x128xf32>
    %124 = math.exp %123 : vector<1x128xf32>
    %125 = arith.subf %37, %122 : vector<1x128xf32>
    %126 = math.exp %125 : vector<1x128xf32>
    %127 = arith.subf %56, %122 : vector<1x128xf32>
    %128 = math.exp %127 : vector<1x128xf32>
    %129 = arith.subf %75, %122 : vector<1x128xf32>
    %130 = math.exp %129 : vector<1x128xf32>
    %131 = arith.subf %94, %122 : vector<1x128xf32>
    %132 = math.exp %131 : vector<1x128xf32>
    %133 = arith.subf %113, %122 : vector<1x128xf32>
    %134 = math.exp %133 : vector<1x128xf32>
    %135 = arith.addf %124, %126 : vector<1x128xf32>
    %136 = arith.addf %135, %128 : vector<1x128xf32>
    %137 = arith.addf %136, %130 : vector<1x128xf32>
    %138 = arith.addf %137, %132 : vector<1x128xf32>
    %139 = arith.addf %138, %134 : vector<1x128xf32>
    %140 = arith.mulf %124, %22 : vector<1x128xf32>
    %141 = arith.mulf %126, %41 : vector<1x128xf32>
    %142 = arith.addf %140, %141 : vector<1x128xf32>
    %143 = arith.mulf %128, %60 : vector<1x128xf32>
    %144 = arith.addf %142, %143 : vector<1x128xf32>
    %145 = arith.mulf %130, %79 : vector<1x128xf32>
    %146 = arith.addf %144, %145 : vector<1x128xf32>
    %147 = arith.mulf %132, %98 : vector<1x128xf32>
    %148 = arith.addf %146, %147 : vector<1x128xf32>
    %149 = arith.mulf %134, %117 : vector<1x128xf32>
    %150 = arith.addf %148, %149 : vector<1x128xf32>
    %151 = tpu.reciprocal %139 {approx = true} : vector<1x128xf32> -> vector<1x128xf32>
    %152 = arith.mulf %150, %151 : vector<1x128xf32>
    %c0_51 = arith.constant 0 : index
    %c0_52 = arith.constant 0 : index
    %153 = vector.load %arg2[%c0_51, %c0_52] : memref<1x128xf32, #tpu.memory_space<vmem>>, vector<1x128xf32>
    %154 = arith.addf %153, %152 : vector<1x128xf32>
    %c0_53 = arith.constant 0 : index
    %c0_54 = arith.constant 0 : index
    %155 = vector.load %arg7[%c0_53, %c0_54] : memref<1x128xf32, #tpu.memory_space<vmem>>, vector<1x128xf32>
    tpu.vector_store %arg7[%c0_53, %c0_54], %154 {strides = array<i32>} : memref<1x128xf32, #tpu.memory_space<vmem>>, vector<1x128xf32>,
    return
  }
  func.func @transform_0(%arg0: i32) -> (i32, i32) {
    %c0_i32 = arith.constant 0 : i32
    %c0_i32_0 = arith.constant 0 : i32
    return %c0_i32, %arg0 : i32, i32
  }
  func.func @transform_1(%arg0: i32) -> (i32, i32) {
    %c0_i32 = arith.constant 0 : i32
    %c0_i32_0 = arith.constant 0 : i32
    return %c0_i32, %arg0 : i32, i32
  }
  func.func @transform_2(%arg0: i32) -> (i32, i32) {
    %c0_i32 = arith.constant 0 : i32
    %c0_i32_0 = arith.constant 0 : i32
    %c0_i32_1 = arith.constant 0 : i32
    return %c0_i32, %c0_i32_0 : i32, i32
  }
  func.func @transform_3(%arg0: i32) -> (i32, i32) {
    %c0_i32 = arith.constant 0 : i32
    %c0_i32_0 = arith.constant 0 : i32
    %c0_i32_1 = arith.constant 0 : i32
    return %c0_i32, %c0_i32_0 : i32, i32
  }
  func.func @transform_4(%arg0: i32) -> (i32, i32) {
    %c0_i32 = arith.constant 0 : i32
    %c0_i32_0 = arith.constant 0 : i32
    %c0_i32_1 = arith.constant 0 : i32
    return %c0_i32, %c0_i32_0 : i32, i32
  }
  func.func @transform_5(%arg0: i32) -> (i32, i32) {
    %c0_i32 = arith.constant 0 : i32
    %c0_i32_0 = arith.constant 0 : i32
    %c0_i32_1 = arith.constant 0 : i32
    return %c0_i32, %c0_i32_0 : i32, i32
  }
  func.func @transform_6(%arg0: i32) -> (i32, i32) {
    %c0_i32 = arith.constant 0 : i32
    %c0_i32_0 = arith.constant 0 : i32
    return %c0_i32, %arg0 : i32, i32
  }
}

</mosaic_0001>

<bundles_post_ra>
// kernel: tpu_custom_call.1
= control target key start
LH: loop header
LB: loop body
LE: loop exit
PB: predicated region body
PF: predicated region fallthrough
CT: control target
= control target key end

     0   :  { %11 = vsyncpa [#allocation3], 0  ;;  %s1655_s0 = inlined_call_operand.hbm [shape: bf16[128,256], index: 0, kind: input, shape index: {}]   ;;  %s1656_s1 = inlined_call_operand.vmem [shape: f32[1,256], index: 1, kind: input, shape index: {}]   ;;  %s1657_s2 = inlined_call_operand.vmem [shape: bf16[16,32], index: 2, kind: input, shape index: {}]   ;;  %s1658_s3 = inlined_call_operand.vmem [shape: f32[16,1], index: 3, kind: input, shape index: {}]   ;;  %s1659_s4 = inlined_call_operand.vmem [shape: f32[16,1], index: 4, kind: input, shape index: {}]   ;;  %s1660_s5 = inlined_call_operand.vmem [shape: f32[32,1], index: 5, kind: input, shape index: {}]   ;;  %s1661_s6 = inlined_call_operand.hbm [shape: f32[1,256], index: 6, kind: output, shape index: {}]  }
   0x1   :  { %13 = vsyncpa [#allocation3 + $0x1], 0 }
   0x2   :  { %14 = vsyncpa [#allocation4], 0 }
   0x3   :  { %16 = vsyncpa [#allocation4 + $0x1], 0  ;;  %s1260_s21 = smov 0   ;;  %s1262_s22 = smov 0  }
   0x4   :  { %s1264_s23 = smov 0   ;;  %s1266_s24 = smov 0  }
   0x5 LB: > { %s1281_s25 = sadd.s32 4294967295, %s1215_s24   ;;  %s932_s26 = sadd.s32 4294967294, %s1215_s24   ;;  %s1215_s24 = sphi %s1266_s24, %s1677_s24   ;;  %s1211_s23 = sphi %s1264_s23, %s1676_s23   ;;  %s1207_s22 = sphi %s1262_s22, %s1675_s22   ;;  %s1203_s21 = sphi %s1260_s21, %s1674_s21  }
   0x6   : > { %s1285_s27 = sadd.s32 1, %s1215_s24   ;;  %s29_s28 = sadd.s32 1, %s1211_s23 }
   0x7   : > { %s26_s29 = ssub.s32 %s1215_s24, %s1285_s27  ;;  %p36_p0 = scmp.ne.s32.totalorder %s1211_s23, %s1207_s22 }
   0x8   : > { %p27_p1 = scmp.eq.s32.totalorder %s26_s29, 0  ;;  %p37_p2 = scmp.eq.s32.totalorder %s1215_s24, 0 }
   0x9   : > { %p42_p3 = scmp.ne.s32.totalorder %s1207_s22, %s1203_s21  ;;  %p43_p4 = scmp.eq.s32.totalorder %s1281_s25, 0 }
   0xa   : > { %s1297_s30 = scalar_select %p27_p1, %s1211_s23, %s29_s28  }
   0xb   : > { %p1299_p5 = por %p37_p2, %p36_p0  ;;  %p1303_p6 = por %p43_p4, %p42_p3 }
   0xc   : > { %p176_p7 = scmp.eq.s32.totalorder %s1281_s25, 1  ;;  %p182_p8 = scmp.eq.s32.totalorder %s932_s26, 1 }
   0xd   : > { %s1665_s8 = scalar_select %p1303_p6, 1, 0 }
   0xe   : > { %p1066_p10 = scmp.lt.s32.totalorder %s1215_s24, 2  ;;  %p1310_p11 = por %p176_p7, %p36_p0 }
   0xf   : > { %p1314_p12 = por %p182_p8, %p42_p3  ;;  %s214_s11 = sand.u32 1, %s1211_s23  }
  0x10   : > { %s1666_s9 = scalar_select %p1310_p11, 1, 0 }
  0x11   : > { %s1667_s10 = scalar_select %p1314_p12, 1, 0 }
  0x12   : > { %s936_s12 = sshll.u32 %s1215_s24, 6  ;;  %s935_s13 = sshll.u32 %s214_s11, 6 }
  0x13   : > { %s1323_s16 = scalar_lea.hbm %s1655_s0, %s936_s12  ;;  %s218_s17 = scalar_lea.vmem [#allocation2], %s935_s13 }
  0x14   : > { %s224_s18 = sshll.u32 %s218_s17, 4  ;;  %p1327_p13 = pnand %p1066_p10, %p1299_p5  ;;  %s1331_s18 = int_to_ptr.vmem [resolvable:$true] %s224_s18 }
  0x15   : > { %s1334_s20 = scalar_lea.sflag [#allocation3], %s214_s11  ;;  %s1123_s26 = scalar_lea.hbm %s1323_s16, 1024 }
  0x16   : > { %p1124_p1 = scmp.ne.s32.totalorder %s1323_s16, %s1123_s26  ;;  %p1125_p2 = pneg %p1327_p13 }
  0x17   : > { %s1128_s7 = scalar_lea.hbm %s1655_s0, 2048  ;;  %p1129_p5 = scmp.lt.s32.totalorder %s1323_s16, %s1655_s0 }
  0x18   : > { %p1126_p3 = pnand %p1125_p2, %p1124_p1  ;;  %p1130_p7 = scmp.lt.s32.totalorder %s1128_s7, %s1123_s26 }
  0x1a   : > { %p1127_p4 = pneg %p1126_p3  ;;  %p1131_p8 = por %p1130_p7, %p1129_p5 }
  0x1c   : > { %p1132_p10 = pnand %p1131_p8, %p1127_p4 }
  0x1e   : > { %1135 = shalt.err (!%p1132_p10)
}
  0x1f   : > { %s1136_s11 = scalar_lea.vmem %s1331_s18, 1024  ;;  %s1217_s14 = smov [#allocation2]  }
  0x20   : > { %p1137_p9 = scmp.ne.s32.totalorder %s1331_s18, %s1136_s11  ;;  %s1141_s15 = sshll.u32 %s1217_s14, 4  ;;  %s1142_s15 = int_to_ptr.vmem [resolvable:$false] %s1141_s15 }
  0x21   : > { %s1143_s17 = scalar_lea.vmem %s1142_s15, 2048  ;;  %p1144_p3 = scmp.lt.s32.totalorder %s1331_s18, %s1142_s15 }
  0x22   : > { %p1139_p0 = pnand %p1137_p9, %p1125_p2  ;;  %p1145_p12 = scmp.lt.s32.totalorder %s1143_s17, %s1136_s11 }
  0x24   : > { %p1140_p1 = pneg %p1139_p0  ;;  %p1146_p11 = por %p1145_p12, %p1144_p3 }
  0x26   : > { %p1147_p6 = pnand %p1146_p11, %p1140_p1 }
  0x28   : > { %1150 = shalt.err (!%p1147_p6)
}
  0x29   : > { %s1218_s26 = smov 128   ;;  %s1219_s28 = smov 64  }
  0x2a   : > { %s1220_s29 = smov 4   ;;  %p238_p9 = scmp.lt.s32.totalorder %s1215_s24, 3 }
  0x2b   : > { %1061 = dma.hbm_to_vmem [thread:$0]  (!%p1327_p13), %s1323_s16, 1024, %s1331_s18, %s1334_s20, %s1218_s26, %s1219_s28, %s1220_s29  }
  0x2c   : > { %p1669_p0 = scmp.ge.s32.totalorder %s1215_s24, 1 }
  0x2e   : > { %p239_p2 = pnand %p1669_p0, %p238_p9 }
  0x2f   : > { %s1359_s7 = sand.u32 (!%p239_p2), 1, %s1207_s22   ;;  %p1670_p6 = scmp.ne.s32.totalorder (!%p239_p2), %s1665_s8, 0 }
  0x30   : > { %242 = sbr.rel (%p239_p2) target bundleno = 365 (0x16d), region = 44  ;;  %s938_s12 = sshll.u32 (!%p239_p2), %s1359_s7, 6 }
  0x31   : > { %s245_s13 = scalar_lea.sflag (!%p239_p2), [#allocation3], %s1359_s7  ;;  %s1363_s11 = scalar_lea.vmem (!%p239_p2), [#allocation2], %s938_s12 }
  0x35   : > { %1194 = dma.done.wait (%p1670_p6), %s245_s13, 1024  }
  0x36   : > { %1196 = vsyncadd (%p1670_p6), %s245_s13, 4294966272  ;;  %v1221_v0 = vmov 0.0   ;;  %vm1222_vm0 = vmmov 0   ;;  %v1223_v1 = vmov 0   ;;  %v981_v2 = vld [vmem:[%s1363_s11 + $0x8] sm:$0xff]   ;;  %v983_v3 = vld [vmem:[%s1363_s11 + $0x18] sm:$0xff]  }
  0x37   : > { %1006 = vmatprep.subr.bf16.mxu0 %v1221_v0  ;;  %1014 = vmatprep.subr.bf16.mxu1 %v1221_v0  ;;  %v985_v4 = vld [vmem:[%s1363_s11 + $0x28] sm:$0xff]   ;;  %v955_v5 = vunpack.c.l.bf16 %v981_v2  ;;  %v956_v6 = vunpack.c.h.bf16 %v981_v2  ;;  %v1378_v7 = vunpack.c.l.bf16 %v983_v3  ;;  %v1380_v8 = vunpack.c.h.bf16 %v983_v3  ;;  %v950_v9 = vld [vmem:[%s1363_s11] sm:$0xff]   ;;  %v982_v10 = vld [vmem:[%s1363_s11 + $0x10] sm:$0xff]   ;;  %p279_p11 = scmp.lt.s32.totalorder %s1281_s25, 1  ;;  %s946_s26 = sshll.u32 %s1281_s25, 4 }
  0x38   : > { %1010 = vmatprep.mubr.msk.bf16.mxu0 %vm1222_vm0, %v1221_v0  ;;  %1018 = vmatprep.mubr.msk.bf16.mxu1 %vm1222_vm0, %v1221_v0  ;;  %v984_v11 = vld [vmem:[%s1363_s11 + $0x20] sm:$0xff]   ;;  %v1385_v12 = vunpack.c.l.bf16 %v985_v4  ;;  %v1387_v13 = vunpack.c.h.bf16 %v985_v4  ;;  %v951_v14 = vunpack.c.l.bf16 %v950_v9  ;;  %v952_v15 = vunpack.c.h.bf16 %v950_v9  ;;  %v987_v20 = vld [vmem:[%s1363_s11 + $0x38] sm:$0xff]   ;;  %v986_v31 = vld [vmem:[%s1363_s11 + $0x30] sm:$0xff]   ;;  %s278_s28 = scalar_lea.vmem [#allocation5], %s1359_s7  ;;  %s855_s11 = scalar_lea.hbm %s1661_s6, %s946_s26 }
  0x39   : > { %1106 = vset.pattern.permute.xlu0 %v1223_v1  ;;  %1107 = vset.pattern.permute.xlu1 %v1223_v1  ;;  %v1390_v16 = vmul.f32 %v1378_v7, %v955_v5  ;;  %v1393_v17 = vmul.f32 %v1380_v8, %v956_v6  ;;  %v1395_v18 = vunpack.c.l.bf16 %v982_v10  ;;  %v1397_v19 = vunpack.c.h.bf16 %v982_v10  ;;  %v285_v21 = vld [vmem:[%s1658_s3] sm:$0xff]  ;;  %v286_v40 = vld [vmem:[%s1658_s3 + $0x8] sm:$0xff]  ;;  %v291_v61 = vld [vmem:[%s1660_s5 + $0x10] sm:$0xff]  ;;  %s280_s20 = scalar_select %p279_p11, %s1281_s25, 1 }
  0x3a   : > { %v1404_v22 = vmul.f32 %v1385_v12, %v955_v5  ;;  %v1407_v23 = vmul.f32 %v1387_v13, %v956_v6  ;;  %v1409_v24 = vunpack.c.l.bf16 %v984_v11  ;;  %v1411_v25 = vunpack.c.h.bf16 %v984_v11  ;;  %317 = vperm.xlu0 %1106, %v285_v21   ;;  %v287_v26 = vld [vmem:[%s1659_s4] sm:$0xff]  ;;  %v288_v46 = vld [vmem:[%s1659_s4 + $0x8] sm:$0xff]  ;;  %v292_v2 = vld [vmem:[%s1660_s5 + $0x18] sm:$0xff]  ;;  %s857_s29 = sshll.u32 %s278_s28, 4  ;;  %s845_s8 = scalar_lea.sflag [#allocation4], %s1359_s7  ;;  %s858_s29 = int_to_ptr.vmem [resolvable:$true] %s857_s29 }
  0x3b   : > { %v314_v27 = vpack.c.bf16 %v1393_v17, %v1390_v16  ;;  %v1419_v28 = vmul.f32 %v1395_v18, %v951_v14  ;;  %v1422_v29 = vmul.f32 %v1397_v19, %v952_v15  ;;  %v979_v30 = vunpack.c.l.bf16 %v987_v20  ;;  %379 = vperm.xlu1 %1107, %v287_v26   ;;  %v1108_v45 = vld [vmem:[%s1657_s2] sm:$0xff]   ;;  %v290_v57 = vld [vmem:[%s1660_s5 + $0x8] sm:$0xff]  ;;  %s281_s17 = scalar_lea.vmem %s1656_s1, %s280_s20  ;;  %s1151_s16 = scalar_lea.vmem %s858_s29, 16 }
  0x3c   : > { %v442_v32 = vpack.c.bf16 %v1407_v23, %v1404_v22  ;;  %v1428_v33 = vmul.f32 %v1409_v24, %v951_v14  ;;  %v1431_v34 = vmul.f32 %v1411_v25, %v952_v15  ;;  %v980_v35 = vunpack.c.h.bf16 %v987_v20  ;;  %v289_v50 = vld [vmem:[%s1660_s5] sm:$0xff]  ;;  %p1152_p12 = scmp.ne.s32.totalorder %s858_s29, %s1151_s16  ;;  %p1671_p13 = scmp.ne.s32.totalorder %s1666_s9, 0 }
  0x3d   : > { %1007 = vmatpush3.bf16.msra.mxu0 %v314_v27  ;;  %v313_v36 = vpack.c.bf16 %v1422_v29, %v1419_v28  ;;  %v1435_v37 = vmul.f32 %v979_v30, %v955_v5  ;;  %v1439_v38 = vmul.f32 %v1385_v12, %v1378_v7  ;;  %v1443_v39 = vmul.f32 %v1387_v13, %v1380_v8  ;;  %s1224_s18 = smov [#allocation5]  }
  0x3e   : > { %1015 = vmatpush3.bf16.msra.mxu1 %v442_v32  ;;  %1008 = vmatprep.subr.bf16.mxu0 %v1221_v0  ;;  %v441_v41 = vpack.c.bf16 %v1431_v34, %v1428_v33  ;;  %v1451_v42 = vmul.f32 %v980_v35, %v956_v6  ;;  %v975_v43 = vunpack.c.l.bf16 %v986_v31  ;;  %v976_v44 = vunpack.c.h.bf16 %v986_v31  ;;  %p1153_p4 = pnand %p1152_p12, %p1671_p13  ;;  %s1155_s19 = sshll.u32 %s1224_s18, 4  ;;  %s1156_s19 = int_to_ptr.vmem [resolvable:$false] %s1155_s19 }
  0x3f   : > { %1016 = vmatprep.subr.bf16.mxu1 %v1221_v0  ;;  %322 = vperm.xlu0 %1106, %v286_v40   ;;  %vm330_vm1 = vcmask 261120   ;;  %v592_v51 = vpack.c.bf16 %v1443_v39, %v1439_v38  ;;  %v1474_v52 = vmul.f32 %v1409_v24, %v1395_v18  ;;  %v1478_v53 = vmul.f32 %v1411_v25, %v1397_v19  ;;  %s1157_s25 = scalar_lea.vmem %s1156_s19, 32  ;;  %p1158_p7 = scmp.lt.s32.totalorder %s858_s29, %s1156_s19 }
  0x40   : > { %v521_v47 = vpack.c.bf16 %v1451_v42, %v1435_v37  ;;  %v1462_v48 = vmul.f32 %v975_v43, %v951_v14  ;;  %v1464_v49 = vmul.f32 %v976_v44, %v952_v15  ;;  %384 = vperm.xlu1 %1107, %v288_v46   ;;  %v1486_v55 = vmul.f32 %v979_v30, %v1378_v7  ;;  %p1154_p5 = pneg %p1153_p4  ;;  %p1159_p8 = scmp.lt.s32.totalorder %s1157_s25, %s1151_s16 }
  0x41   : > { %1009 = vmatpush3.bf16.msra.mxu0 %v313_v36  ;;  %v1489_v56 = vmul.f32 %v980_v35, %v1380_v8  ;;  %v591_v58 = vpack.c.bf16 %v1478_v53, %v1474_v52  ;;  %v1498_v59 = vmul.f32 %v979_v30, %v1385_v12  ;;  %v1501_v60 = vmul.f32 %v980_v35, %v1387_v13 }
  0x42   : > { %1017 = vmatpush3.bf16.msra.mxu1 %v441_v41  ;;  %1022 = vmatprep.subr.bf16.mxu0 %v1221_v0  ;;  %v520_v54 = vpack.c.bf16 %v1464_v49, %v1462_v48  ;;  %v1514_v63 = vmul.f32 %v975_v43, %v1395_v18  ;;  %v1517_v1 = vmul.f32 %v976_v44, %v1397_v19  ;;  %p1160_p10 = por %p1159_p8, %p1158_p7 }
  0x43   : > { %1030 = vmatprep.subr.bf16.mxu1 %v1221_v0  ;;  %398 = vperm.xlu0 %1106, %v289_v50   ;;  %v663_v62 = vpack.c.bf16 %v1489_v56, %v1486_v55  ;;  %v734_v3 = vpack.c.bf16 %v1501_v60, %v1498_v59  ;;  %v1526_v4 = vmul.f32 %v975_v43, %v1409_v24 }
  0x44   : > { %1011 = vmatmul.mubr.msk.bf16.vlgmr.msra.gmra.mxu0 %vm330_vm1, %v1108_v45  ;;  %403 = vperm.xlu1 %1107, %v290_v57   ;;  %v1529_v5 = vmul.f32 %v976_v44, %v1411_v25  ;;  %v662_v6 = vpack.c.bf16 %v1517_v1, %v1514_v63  ;;  %p1161_p1 = pnand %p1160_p10, %p1154_p5 }
  0x45   : > { %1019 = vmatmul.mubr.msk.bf16.vlgmr.msra.gmra.mxu1 %vm330_vm1, %v1108_v45  ;;  %1023 = vmatpush3.bf16.msra.mxu0 %v521_v47 }
  0x46   : > { %1031 = vmatpush3.bf16.msra.mxu1 %v592_v51  ;;  %1024 = vmatprep.subr.bf16.mxu0 %v1221_v0  ;;  %v733_v7 = vpack.c.bf16 %v1529_v5, %v1526_v4 }
  0x47   : > { %1032 = vmatprep.subr.bf16.mxu1 %v1221_v0  ;;  %1026 = vmatprep.mubr.msk.bf16.mxu0 %vm1222_vm0, %v1221_v0 }
  0x48   : > { %1034 = vmatprep.mubr.msk.bf16.mxu1 %vm1222_vm0, %v1221_v0  ;;  %408 = vperm.xlu0 %1106, %v291_v61  }
  0x49   : > { %1025 = vmatpush3.bf16.msra.mxu0 %v520_v54  ;;  %413 = vperm.xlu1 %1107, %v292_v2  }
  0x4a   : > { %1033 = vmatpush3.bf16.msra.mxu1 %v591_v58  ;;  %1038 = vmatprep.subr.bf16.mxu0 %v1221_v0 }
  0x4b   : > { %1046 = vmatprep.subr.bf16.mxu1 %v1221_v0 }
  0x4c   : > { %1027 = vmatmul.mubr.msk.bf16.vlgmr.msra.gmra.mxu0 %vm330_vm1, %v1108_v45 }
  0x4d   : > { %1035 = vmatmul.mubr.msk.bf16.vlgmr.msra.gmra.mxu1 %vm330_vm1, %v1108_v45  ;;  %1039 = vmatpush3.bf16.msra.mxu0 %v663_v62 }
  0x4e   : > { %1047 = vmatpush3.bf16.msra.mxu1 %v734_v3  ;;  %1040 = vmatprep.subr.bf16.mxu0 %v1221_v0 }
  0x4f   : > { %1048 = vmatprep.subr.bf16.mxu1 %v1221_v0  ;;  %1042 = vmatprep.mubr.msk.bf16.mxu0 %vm1222_vm0, %v1221_v0 }
  0x50   : > { %1050 = vmatprep.mubr.msk.bf16.mxu1 %vm1222_vm0, %v1221_v0 }
  0x51   : > { %1041 = vmatpush3.bf16.msra.mxu0 %v662_v6 }
  0x52   : > { %1049 = vmatpush3.bf16.msra.mxu1 %v733_v7 }
  0x54   : > { %1043 = vmatmul.mubr.msk.bf16.vlgmr.msra.gmra.mxu0 %vm330_vm1, %v1108_v45 }
  0x55   : > { %1051 = vmatmul.mubr.msk.bf16.vlgmr.msra.gmra.mxu1 %vm330_vm1, %v1108_v45 }
  0xb5   : > { %v318_v8 = vpop.permute.xlu0 %317 }
  0xb6   : > { %v1546_v12 = vpop.permute.xlu1 %379 }
  0xba   : > { %v323_v18 = vpop.permute.xlu0 %322 }
  0xbb   : > { %v1548_v31 = vpop.permute.xlu1 %384 }
 0x104   : > { %v368_v9 = vpop.f32.mrf.mxu0 }
 0x105   : > { %v369_v10 = vadd.f32 %v368_v9, %v318_v8  ;;  %v477_v11 = vpop.f32.mrf.mxu1 }
 0x106   : > { %v478_v13 = vadd.f32 %v477_v11, %v318_v8  ;;  %v1012_v14 = vpop.f32.mrf.mxu0 }
 0x107   : > { %v1020_v15 = vpop.f32.mrf.mxu1  ;;  %v375_v20 = vmax.f32 %v369_v10, 0.0 }
 0x108   : > { %v371_v19 = vpop.f32.mrf.mxu0  ;;  %v484_v24 = vmax.f32 %v478_v13, 0.0 }
 0x109   : > { %v372_v21 = vadd.f32 %v371_v19, %v323_v18  ;;  %v480_v0 = vpop.f32.mrf.mxu1  ;;  %v387_v36 = vmul.f32 %v1546_v12, %v375_v20 }
 0x10a   : > { %v481_v25 = vadd.f32 %v480_v0, %v323_v18  ;;  %v1013_v26 = vpop.f32.mrf.mxu0  ;;  %v486_v44 = vmul.f32 %v484_v24, %v1546_v12 }
 0x10b   : > { %v376_v27 = vmax.f32 %v372_v21, 0.0  ;;  %v1021_v30 = vpop.f32.mrf.mxu1 }
 0x10c   : > { %v485_v32 = vmax.f32 %v481_v25, 0.0  ;;  %v556_v35 = vpop.f32.mrf.mxu0 }
 0x10d   : > { %v388_v40 = vmul.f32 %v1548_v31, %v376_v27  ;;  %v557_v41 = vadd.f32 %v556_v35, %v318_v8  ;;  %v627_v43 = vpop.f32.mrf.mxu1 }
 0x10e   : > { %v487_v45 = vmul.f32 %v485_v32, %v1548_v31  ;;  %v628_v46 = vadd.f32 %v627_v43, %v318_v8  ;;  %v1028_v47 = vpop.f32.mrf.mxu0 }
 0x10f   : > { %v389_v50 = vadd.f32 %v388_v40, %v387_v36  ;;  %v1036_v51 = vpop.f32.mrf.mxu1  ;;  %v563_v61 = vmax.f32 %v557_v41, 0.0 }
 0x110   : > { %v488_v54 = vadd.f32 %v487_v45, %v486_v44  ;;  %v559_v57 = vpop.f32.mrf.mxu0  ;;  %v634_v6 = vmax.f32 %v628_v46, 0.0 }
 0x111   : > { %v390_v58 = vrot.slane %v389_v50, 4  ;;  %v560_v62 = vadd.f32 %v559_v57, %v323_v18  ;;  %v630_v2 = vpop.f32.mrf.mxu1  ;;  %v565_v21 = vmul.f32 %v563_v61, %v1546_v12 }
 0x112   : > { %v489_v3 = vrot.slane %v488_v54, 4  ;;  %v631_v7 = vadd.f32 %v630_v2, %v323_v18  ;;  %v1029_v9 = vpop.f32.mrf.mxu0  ;;  %v636_v27 = vmul.f32 %v634_v6, %v1546_v12  ;;  %v1560_v6 = vpop.permute.xlu1 %403 }
 0x113   : > { %v391_v10 = vadd.f32 %v390_v58, %v389_v50  ;;  %v564_v11 = vmax.f32 %v560_v62, 0.0  ;;  %v1037_v13 = vpop.f32.mrf.mxu1 }
 0x114   : > { %v490_v14 = vadd.f32 %v489_v3, %v488_v54  ;;  %v635_v15 = vmax.f32 %v631_v7, 0.0  ;;  %v698_v19 = vpop.f32.mrf.mxu0  ;;  %v1558_v54 = vpop.permute.xlu0 %398 }
 0x115   : > { %v392_v20 = vrot.slane %v391_v10, 2  ;;  %v566_v0 = vmul.f32 %v564_v11, %v1548_v31  ;;  %v699_v24 = vadd.f32 %v698_v19, %v318_v8  ;;  %v769_v25 = vpop.f32.mrf.mxu1 }
 0x116   : > { %v491_v26 = vrot.slane %v490_v14, 2  ;;  %v637_v30 = vmul.f32 %v635_v15, %v1548_v31  ;;  %v770_v32 = vadd.f32 %v769_v25, %v318_v8  ;;  %v1044_v35 = vpop.f32.mrf.mxu0 }
 0x117   : > { %v567_v36 = vadd.f32 %v566_v0, %v565_v21  ;;  %v1052_v40 = vpop.f32.mrf.mxu1  ;;  %v393_v41 = vadd.f32 %v392_v20, %v391_v10  ;;  %v705_v47 = vmax.f32 %v699_v24, 0.0  ;;  %v416_v21 = vmul.f32 %v1558_v54, %v1419_v28 }
 0x118   : > { %v638_v43 = vadd.f32 %v637_v30, %v636_v27  ;;  %v701_v44 = vpop.f32.mrf.mxu0  ;;  %v492_v45 = vadd.f32 %v491_v26, %v490_v14  ;;  %v776_v58 = vmax.f32 %v770_v32, 0.0  ;;  %v417_v0 = vmul.f32 %v1560_v6, %v1422_v29  ;;  %v409_v32 = vpop.permute.xlu0 %408 }
 0x119   : > { %v568_v46 = vrot.slane %v567_v36, 4  ;;  %v702_v50 = vadd.f32 %v701_v44, %v323_v18  ;;  %v772_v51 = vpop.f32.mrf.mxu1  ;;  %v394_v7 = vrot.slane %v393_v41, 1  ;;  %v707_v14 = vmul.f32 %v705_v47, %v1546_v12 }
 0x11a   : > { %v639_v57 = vrot.slane %v638_v43, 4  ;;  %v773_v61 = vadd.f32 %v772_v51, %v323_v18  ;;  %v1045_v62 = vpop.f32.mrf.mxu0  ;;  %v493_v11 = vrot.slane %v492_v45, 1  ;;  %v778_v20 = vmul.f32 %v776_v58, %v1546_v12 }
 0x11b   : > { %v569_v2 = vadd.f32 %v568_v46, %v567_v36  ;;  %v706_v3 = vmax.f32 %v702_v50, 0.0  ;;  %v1053_v8 = vpop.f32.mrf.mxu1  ;;  %v495_v26 = vmul.f32 %v1428_v33, %v1558_v54  ;;  %v496_v27 = vmul.f32 %v1431_v34, %v1560_v6 }
 0x11c   : > { %v640_v9 = vadd.f32 %v639_v57, %v638_v43  ;;  %v777_v10 = vmax.f32 %v773_v61, 0.0  ;;  %v1574_v30 = vadd.f32 %v394_v7, %v393_v41  ;;  %v494_v35 = vadd.f32 %v493_v11, %v492_v45  ;;  %v1579_v41 = vpop.permute.xlu1 %413 }
 0x11d   : > { %v570_v13 = vrot.slane %v569_v2, 2  ;;  %v708_v15 = vmul.f32 %v706_v3, %v1548_v31  ;;  %v420_v43 = vadd.f32 %v417_v0, %v416_v21  ;;  %v418_v29 = vmul.f32 %v409_v32, %v1390_v16 }
 0x11e   : > { %v641_v19 = vrot.slane %v640_v9, 2  ;;  %v779_v18 = vmul.f32 %v777_v10, %v1548_v31  ;;  %v499_v47 = vadd.f32 %v496_v27, %v495_v26  ;;  %v497_v33 = vmul.f32 %v1404_v22, %v409_v32 }
 0x11f   : > { %v571_v24 = vadd.f32 %v570_v13, %v569_v2  ;;  %v709_v25 = vadd.f32 %v708_v15, %v707_v14  ;;  %v800_v34 = vmax.f32 %v1574_v30, %v494_v35  ;;  %v574_v45 = vmul.f32 %v1462_v48, %v1558_v54 }
 0x120   : > { %v780_v12 = vadd.f32 %v779_v18, %v778_v20  ;;  %v642_v36 = vadd.f32 %v641_v19, %v640_v9  ;;  %v645_v58 = vmul.f32 %v1474_v52, %v1558_v54  ;;  %v575_v16 = vmul.f32 %v1464_v49, %v1560_v6 }
 0x121   : > { %v572_v31 = vrot.slane %v571_v24, 1  ;;  %v710_v40 = vrot.slane %v709_v25, 4  ;;  %v646_v22 = vmul.f32 %v1478_v53, %v1560_v6  ;;  %v421_v62 = vadd.f32 %v420_v43, %v418_v29 }
 0x122   : > { %v781_v28 = vrot.slane %v780_v12, 4  ;;  %v643_v51 = vrot.slane %v642_v36, 1  ;;  %v500_v8 = vadd.f32 %v499_v47, %v497_v33  ;;  %v419_v7 = vmul.f32 %v1579_v41, %v1393_v17 }
 0x123   : > { %v573_v44 = vadd.f32 %v572_v31, %v571_v24  ;;  %v711_v46 = vadd.f32 %v710_v40, %v709_v25  ;;  %v498_v48 = vmul.f32 %v1407_v23, %v1579_v41  ;;  %v578_v11 = vadd.f32 %v575_v16, %v574_v45 }
 0x124   : > { %v782_v50 = vadd.f32 %v781_v28, %v780_v12  ;;  %v644_v10 = vadd.f32 %v643_v51, %v642_v36  ;;  %v576_v49 = vmul.f32 %v1435_v37, %v409_v32  ;;  %v716_v53 = vmul.f32 %v1514_v63, %v1558_v54 }
 0x125   : > { %v712_v57 = vrot.slane %v711_v46, 2  ;;  %v801_v2 = vmax.f32 %v800_v34, %v573_v44  ;;  %v717_v14 = vmul.f32 %v1517_v1, %v1560_v6  ;;  %v649_v20 = vadd.f32 %v646_v22, %v645_v58 }
 0x126   : > { %v783_v61 = vrot.slane %v782_v50, 2  ;;  %v647_v17 = vmul.f32 %v1439_v38, %v409_v32  ;;  %v422_v18 = vadd.f32 %v421_v62, %v419_v7  ;;  %v501_v23 = vadd.f32 %v500_v8, %v498_v48 }
 0x127   : > { %v713_v3 = vadd.f32 %v712_v57, %v711_v46  ;;  %v802_v15 = vmax.f32 %v801_v2, %v644_v10  ;;  %v579_v24 = vadd.f32 %v578_v11, %v576_v49  ;;  %v577_v37 = vmul.f32 %v1451_v42, %v1579_v41 }
 0x128   : > { %v784_v9 = vadd.f32 %v783_v61, %v782_v50  ;;  %v787_v25 = vmul.f32 %v1526_v4, %v1558_v54  ;;  %v788_v63 = vmul.f32 %v1529_v5, %v1560_v6  ;;  %v720_v1 = vadd.f32 %v717_v14, %v716_v53 }
 0x129   : > { %v714_v52 = vrot.slane %v713_v3, 1  ;;  %v650_v27 = vadd.f32 %v649_v20, %v647_v17  ;;  %v718_v12 = vmul.f32 %v1486_v55, %v409_v32  ;;  %v423_v38 = vrot.slane %v422_v18, 4 }
 0x12a   : > { %v785_v13 = vrot.slane %v784_v9, 1  ;;  %v502_v31 = vrot.slane %v501_v23, 4  ;;  %v648_v36 = vmul.f32 %v1443_v39, %v1579_v41  ;;  %v580_v43 = vadd.f32 %v579_v24, %v577_v37 }
 0x12b   : > { %v715_v19 = vadd.f32 %v714_v52, %v713_v3  ;;  %v791_v4 = vadd.f32 %v788_v63, %v787_v25  ;;  %v789_v54 = vmul.f32 %v1498_v59, %v409_v32  ;;  %v424_v46 = vadd.f32 %v423_v38, %v422_v18 }
 0x12c   : > { %v786_v0 = vadd.f32 %v785_v13, %v784_v9  ;;  %v503_v47 = vadd.f32 %v502_v31, %v501_v23  ;;  %v721_v50 = vadd.f32 %v720_v1, %v718_v12  ;;  %v651_v34 = vadd.f32 %v650_v27, %v648_v36 }
 0x12d   : > { %v803_v21 = vmax.f32 %v802_v15, %v715_v19  ;;  %v719_v39 = vmul.f32 %v1489_v56, %v1579_v41  ;;  %v425_v51 = vrot.slane %v424_v46, 2  ;;  %v792_v32 = vadd.f32 %v791_v4, %v789_v54 }
 0x12e   : > { %v504_v57 = vrot.slane %v503_v47, 2  ;;  %v652_v45 = vrot.slane %v651_v34, 4  ;;  %v790_v16 = vmul.f32 %v1501_v60, %v1579_v41 }
 0x12f   : > { %v804_v26 = vmax.f32 %v803_v21, %v786_v0  ;;  %v722_v58 = vadd.f32 %v721_v50, %v719_v39  ;;  %v426_v62 = vadd.f32 %v425_v51, %v424_v46  ;;  %v841_v39 = vld [vmem:[%s281_s17] sm:$0x1] }
 0x130   : > { %v505_v56 = vadd.f32 %v504_v57, %v503_v47  ;;  %v653_v2 = vadd.f32 %v652_v45, %v651_v34  ;;  %v793_v8 = vadd.f32 %v792_v32, %v790_v16 }
 0x131   : > { %v805_v40 = vsub.f32 %v1574_v30, %v804_v26  ;;  %v808_v28 = vsub.f32 %v494_v35, %v804_v26  ;;  %v811_v42 = vsub.f32 %v573_v44, %v804_v26  ;;  %v814_v29 = vsub.f32 %v644_v10, %v804_v26 }
 0x132   : > { %v817_v55 = vsub.f32 %v715_v19, %v804_v26  ;;  %v581_v30 = vrot.slane %v580_v43, 4  ;;  %v820_v44 = vsub.f32 %v786_v0, %v804_v26  ;;  %v723_v3 = vrot.slane %v722_v58, 4 }
 0x133   : > { %v806_v5 = vmul.f32 1.442695, %v805_v40  ;;  %v809_v6 = vmul.f32 1.442695, %v808_v28  ;;  %v812_v33 = vmul.f32 1.442695, %v811_v42 }
 0x134   : > { %v815_v35 = vmul.f32 1.442695, %v814_v29  ;;  %v818_v59 = vmul.f32 1.442695, %v817_v55  ;;  %v582_v61 = vadd.f32 %v581_v30, %v580_v43  ;;  %v821_v22 = vmul.f32 1.442695, %v820_v44 }
 0x135   : > { %1109 = vpow2.f32 %v806_v5  ;;  %v427_v48 = vrot.slane %v426_v62, 1  ;;  %v506_v9 = vrot.slane %v505_v56, 1  ;;  %v654_v10 = vrot.slane %v653_v2, 2 }
 0x136   : > { %1111 = vpow2.f32 %v809_v6  ;;  %v583_v7 = vrot.slane %v582_v61, 2  ;;  %v724_v52 = vadd.f32 %v723_v3, %v722_v58  ;;  %v794_v11 = vrot.slane %v793_v8, 4 }
 0x137   : > { %1113 = vpow2.f32 %v812_v33  ;;  %v428_v60 = vadd.f32 %v427_v48, %v426_v62  ;;  %v507_v41 = vadd.f32 %v506_v9, %v505_v56  ;;  %v655_v19 = vadd.f32 %v654_v10, %v653_v2 }
 0x138   : > { %1115 = vpow2.f32 %v815_v35  ;;  %v584_v13 = vadd.f32 %v583_v7, %v582_v61  ;;  %v725_v20 = vrot.slane %v724_v52, 2  ;;  %v795_v17 = vadd.f32 %v794_v11, %v793_v8 }
 0x139   : > { %1117 = vpow2.f32 %v818_v59  ;;  %v656_v27 = vrot.slane %v655_v19, 1 }
 0x13a   : > { %1119 = vpow2.f32 %v821_v22  ;;  %v585_v18 = vrot.slane %v584_v13, 1  ;;  %v726_v63 = vadd.f32 %v725_v20, %v724_v52  ;;  %v796_v1 = vrot.slane %v795_v17, 2 }
 0x13b   : > { %v657_v42 = vadd.f32 %v656_v27, %v655_v19 }
 0x13c   : > { %v586_v26 = vadd.f32 %v585_v18, %v584_v13  ;;  %v797_v28 = vadd.f32 %v796_v1, %v795_v17  ;;  %v727_v43 = vrot.slane %v726_v63, 1 }
 0x13e   : > { %v728_v54 = vadd.f32 %v727_v43, %v726_v63  ;;  %v798_v5 = vrot.slane %v797_v28, 1 }
 0x140   : > { %v799_v47 = vadd.f32 %v798_v5, %v797_v28 }
 0x142   : > { %v1110_v49 = vpop.eup %1109 }
 0x143   : > { %v1112_v53 = vpop.eup %1111  ;;  %v828_v21 = vmul.f32 %v1110_v49, %v428_v60 }
 0x144   : > { %v823_v14 = vadd.f32 %v1112_v53, %v1110_v49  ;;  %v1114_v15 = vpop.eup %1113  ;;  %v829_v0 = vmul.f32 %v1112_v53, %v507_v41 }
 0x145   : > { %v1116_v24 = vpop.eup %1115  ;;  %v831_v40 = vmul.f32 %v1114_v15, %v586_v26 }
 0x146   : > { %v824_v23 = vadd.f32 %v1114_v15, %v823_v14  ;;  %v1118_v25 = vpop.eup %1117  ;;  %v830_v38 = vadd.f32 %v829_v0, %v828_v21  ;;  %v833_v4 = vmul.f32 %v1116_v24, %v657_v42 }
 0x147   : > { %v1120_v31 = vpop.eup %1119  ;;  %v835_v46 = vmul.f32 %v1118_v25, %v728_v54 }
 0x148   : > { %v825_v37 = vadd.f32 %v1116_v24, %v824_v23  ;;  %v832_v29 = vadd.f32 %v831_v40, %v830_v38  ;;  %v837_v55 = vmul.f32 %v1120_v31, %v799_v47 }
 0x14a   : > { %v826_v12 = vadd.f32 %v1118_v25, %v825_v37  ;;  %v834_v6 = vadd.f32 %v833_v4, %v832_v29 }
 0x14c   : > { %v827_v36 = vadd.f32 %v1120_v31, %v826_v12  ;;  %v836_v33 = vadd.f32 %v835_v46, %v834_v6 }
 0x14e   : > { %1121 = vrcp.f32 %v827_v36  ;;  %v838_v50 = vadd.f32 %v837_v55, %v836_v33 }
 0x15b   : > { %v1122_v34 = vpop.eup %1121 }
 0x15c   : > { %v840_v30 = vmul.f32 %v1122_v34, %v838_v50 }
 0x15e   : > { %v842_v35 = vadd.f32 %v841_v39, %v840_v30 }
 0x160   : > { %843 = vst [vmem:[%s278_s28] sm:$0x1] %v842_v35 }
 0x161   : > { %1164 = shalt.err (!%p1161_p1)
}
 0x162   : > { %s1165_s20 = scalar_lea.hbm %s855_s11, 16  ;;  %s1169_s15 = scalar_lea.hbm %s1661_s6, 32 }
 0x163   : > { %p1166_p3 = scmp.ne.s32.totalorder %s855_s11, %s1165_s20  ;;  %p1170_p2 = scmp.lt.s32.totalorder %s855_s11, %s1661_s6 }
 0x164   : > { %p1171_p6 = scmp.lt.s32.totalorder %s1169_s15, %s1165_s20 }
 0x165   : > { %p1167_p9 = pnand %p1166_p3, %p1671_p13 }
 0x166   : > { %p1172_p11 = por %p1171_p6, %p1170_p2 }
 0x167   : > { %p1168_p0 = pneg %p1167_p9 }
 0x169   : > { %p1173_p12 = pnand %p1172_p11, %p1168_p0 }
 0x16b   : > { %1176 = shalt.err (!%p1173_p12)
}
 0x16c   : > { %1056 = dma.vmem_to_hbm [thread:$0]  (%p1671_p13), %s858_s29, 16, %s855_s11, %s845_s8  }
 0x16d PF: > { %s869_s28 = sand.u32 1, %s1203_s21   ;;  %p1672_p4 = scmp.ne.s32.totalorder %s1667_s10, 0 }
 0x16e   : > { %p1673_p5 = scmp.ge.s32.totalorder %s1215_s24, 2  ;;  %s870_s12 = scalar_lea.sflag [#allocation4], %s869_s28 }
 0x170   : > { %p1063_p7 = pnand %p1673_p5, %p1672_p4 }
 0x172   : > { %p1064_p8 = pneg %p1063_p7 }
 0x174   : > { %1198 = dma.done.wait (%p1064_p8), %s870_s12, 16  }
 0x175   : > { %1200 = vsyncadd (%p1064_p8), %s870_s12, 4294967280  ;;  %p19_p10 = scmp.ge.s32.totalorder %s1285_s27, 4   ;;  %s1674_s21 = smov %s1207_s22 }
 0x176   : > { %s1675_s22 = smov %s1211_s23  ;;  %s1676_s23 = smov %s1297_s30 }
 0x177   : > { %s1677_s24 = smov %s1285_s27  ;;  %21 = sbr.rel (!%p19_p10) target bundleno = 5 (0x5), region = 92 }
 0x17c   :  { %874 = vsyncpa [#allocation3], 1 }
 0x17d   :  { %876 = vsyncpa [#allocation3 + $0x1], 1 }
 0x17e   :  { %877 = vsyncpa [#allocation4], 1 }
 0x17f   :  { %879 = vsyncpa [#allocation4 + $0x1], 1 }

</bundles_post_ra>
